<compile_context>
chip_gen: v7x
topology: tpu7x:2x2x1
jax: 0.10.0
libtpu: 0.0.40
codegen_flags: <defaults>
</compile_context>

<pallas_src>
import math

import jax
import jax.numpy as jnp
from jax.experimental import pallas as pl
from jax.experimental.pallas import tpu as pltpu

BN_EPS = 1e-5
LANE = 128


def _rup(x, m):
    return ((x + m - 1) // m) * m


def _pad2(a, rows, cols):
    r, c = a.shape
    return jnp.pad(a, ((0, rows - r), (0, cols - c)))


# ---------------------------------------------------------------------------
# Kernel A: tiled spmm  (msg = adj @ x), bf16 adjacency, f32 accumulation
# ---------------------------------------------------------------------------
def _spmm_kernel(adj_ref, x_ref, msg_ref, acc_ref):
    k = pl.program_id(1)

    @pl.when(k == 0)
    def _():
        acc_ref[...] = jnp.zeros_like(acc_ref)

    acc_ref[...] += jnp.dot(adj_ref[...].astype(jnp.float32), x_ref[...],
                            preferred_element_type=jnp.float32)

    @pl.when(k == pl.num_programs(1) - 1)
    def _():
        msg_ref[...] = acc_ref[...]


def spmm_pallas(adj_bf16, x, *, tile_m=256, tile_k=256):
    """adj_bf16: (Np, Np) bf16 0/1 adjacency; x: (Np, Fp) f32 -> (Np, Fp) f32."""
    np_, _ = adj_bf16.shape
    fp = x.shape[1]
    assert np_ % tile_m == 0 and np_ % tile_k == 0
    assert tile_k % LANE == 0 and tile_m % 8 == 0 and fp % LANE == 0
    grid = (np_ // tile_m, np_ // tile_k)
    return pl.pallas_call(
        _spmm_kernel,
        out_shape=jax.ShapeDtypeStruct((np_, fp), jnp.float32),
        grid_spec=pltpu.PrefetchScalarGridSpec(
            num_scalar_prefetch=0,
            grid=grid,
            in_specs=[pl.BlockSpec((tile_m, tile_k), lambda i, k: (i, k)),
                      pl.BlockSpec((tile_k, fp), lambda i, k: (k, 0))],
            out_specs=pl.BlockSpec((tile_m, fp), lambda i, k: (i, 0)),
            scratch_shapes=[pltpu.VMEM((tile_m, fp), jnp.float32)],
        ),
        compiler_params=pltpu.CompilerParams(
            dimension_semantics=("parallel", "arbitrary")),
    )(adj_bf16, x)


# ---------------------------------------------------------------------------
# Kernel B: MLP with split-concat matmul, folded training-mode BatchNorm
# ---------------------------------------------------------------------------
def _bn_fold(h, gamma, beta):
    # Training-mode BatchNorm1d (batch mean, biased batch variance) folded into
    # a single scale/shift per channel.  Padded channels carry gamma=beta=0, so
    # they stay exactly zero.
    mean = jnp.mean(h, axis=0, keepdims=True)
    diff = h - mean
    var = jnp.mean(diff * diff, axis=0, keepdims=True)
    scale = gamma * jax.lax.rsqrt(var + BN_EPS)
    shift = beta - mean * scale
    return h * scale + shift


def _make_mlp_kernel(num_extra_stages, final_relu):
    def kernel(*refs):
        x_ref, msg_ref = refs[0], refs[1]
        bn0_ref, wx_ref, wm_ref, b0_ref = refs[2:6]
        extra = refs[6:6 + 3 * num_extra_stages]
        out_ref = refs[6 + 3 * num_extra_stages]

        bn0 = bn0_ref[...]                        # rows: gx, gm, bx, bm
        xb = _bn_fold(x_ref[...], bn0[0:1, :], bn0[2:3, :])
        mb = _bn_fold(msg_ref[...], bn0[1:2, :], bn0[3:4, :])

        # agg='cat' + stage-0 Linear as a split matmul: cat([x, msg]) @ W ==
        # x @ W[:F] + msg @ W[F:]  -> no (N, 2F) concat / lane-misaligned copy.
        h = (jnp.dot(xb, wx_ref[...], preferred_element_type=jnp.float32)
             + jnp.dot(mb, wm_ref[...], preferred_element_type=jnp.float32)
             + b0_ref[...])

        for s in range(num_extra_stages):
            bn_ref, w_ref, b_ref = extra[3 * s:3 * s + 3]
            bn = bn_ref[...]
            h = _bn_fold(h, bn[0:1, :], bn[1:2, :])
            h = jnp.maximum(h, 0.0)               # ReLU; Dropout(p=0) = identity
            h = jnp.dot(h, w_ref[...], preferred_element_type=jnp.float32) + b_ref[...]

        if final_relu:                            # inter-layer ReLU of ExpGraphNN_ND
            h = jnp.maximum(h, 0.0)

        out_ref[...] = h

    return kernel


def mlp_pallas(x, msg, lp, final_relu):
    n = x.shape[0]
    flat = [lp["bn0"], lp["wx"], lp["wm"], lp["b0"]]
    for bn, w, b in lp["stages"]:
        flat += [bn, w, b]
    kernel = _make_mlp_kernel(len(lp["stages"]), final_relu)
    return pl.pallas_call(
        kernel,
        out_shape=jax.ShapeDtypeStruct((n, lp["out_dim_p"]), jnp.float32),
    )(x, msg, *flat)


# ---------------------------------------------------------------------------
# Parameter construction (PyTorch-default-style init) + padded/packed packing
# ---------------------------------------------------------------------------
def _init_linear(key, fan_in, fan_out):
    k_w, k_b = jax.random.split(key)
    bound = 1.0 / math.sqrt(fan_in)
    w = jax.random.uniform(k_w, (fan_out, fan_in), jnp.float32, -bound, bound)
    b = jax.random.uniform(k_b, (fan_out,), jnp.float32, -bound, bound)
    return w.T, b.reshape(1, -1)                  # W stored transposed (in, out)


def _pack_layer(raw_stages, in_dim, out_dims):
    in_p = _rup(in_dim, LANE)
    out_ps = [_rup(d, LANE) for d in out_dims]

    gamma0, beta0, w0_t, b0 = raw_stages[0]
    # Split the stage-0 BN / Linear at the concat boundary (x | msg).
    bn0 = jnp.concatenate([
        _pad2(gamma0[:, :in_dim], 1, in_p), _pad2(gamma0[:, in_dim:], 1, in_p),
        _pad2(beta0[:, :in_dim], 1, in_p), _pad2(beta0[:, in_dim:], 1, in_p)],
        axis=0)                                   # (4, in_p): gx, gm, bx, bm
    wx = _pad2(w0_t[:in_dim, :], in_p, out_ps[0])
    wm = _pad2(w0_t[in_dim:, :], in_p, out_ps[0])
    b0p = _pad2(b0, 1, out_ps[0])

    stages = []
    for s in range(1, len(out_dims)):
        gamma, beta, w_t, b = raw_stages[s]
        d_in_p, d_out_p = out_ps[s - 1], out_ps[s]
        bn = jnp.concatenate([_pad2(gamma, 1, d_in_p), _pad2(beta, 1, d_in_p)],
                             axis=0)              # (2, d_in_p)
        stages.append((bn, _pad2(w_t, d_in_p, d_out_p), _pad2(b, 1, d_out_p)))

    return dict(in_dim=in_dim, in_dim_p=in_p,
                out_dim=out_dims[-1], out_dim_p=out_ps[-1],
                bn0=bn0, wx=wx, wm=wm, b0=b0p, stages=stages)


def build_exp_graph_nn_nd(key, in_features, phi_features, out_features):
    """Returns (raw_params for the pure-JAX reference, packed/padded kernel params)."""
    assert len(phi_features) == len(out_features), "layers mismatch"
    raw_layers, kernel_layers = [], []
    cur_in = in_features
    for pf, out_dims in zip(phi_features, out_features):
        # phi = identity (module default) => message has cur_in channels.
        assert pf == cur_in, "phi=identity requires phi_features == layer input dim"
        mlp_in = cur_in + pf                      # agg == 'cat'
        dims = [mlp_in] + list(out_dims)
        raw_stages = []
        for s in range(len(out_dims)):
            key, sub = jax.random.split(key)
            gamma = jnp.ones((1, dims[s]), jnp.float32)   # BatchNorm1d defaults
            beta = jnp.zeros((1, dims[s]), jnp.float32)
            w_t, b = _init_linear(sub, dims[s], dims[s + 1])
            raw_stages.append((gamma, beta, w_t, b))
        raw_layers.append(raw_stages)
        kernel_layers.append(_pack_layer(raw_stages, cur_in, out_dims))
        cur_in = out_dims[-1]
    return raw_layers, kernel_layers


# ---------------------------------------------------------------------------
# Forward pass
# ---------------------------------------------------------------------------
def dgnn_layer_forward(x, adj_b, lp, final_relu, n_true, tile):
    np_ = adj_b.shape[0]
    x_rows = x if np_ == n_true else jnp.pad(x, ((0, np_ - n_true), (0, 0)))
    msg = spmm_pallas(adj_b, x_rows, tile_m=tile, tile_k=tile)
    if np_ != n_true:
        msg = msg[:n_true]                         # drop padded graph nodes
    return mlp_pallas(x, msg, lp, final_relu)


def exp_graph_nn_nd_forward(kernel_params, node_features, adj, *, tile=256):
    """ExpGraphNN_ND.forward — returns (x, support), with support == x."""
    assert tile % LANE == 0
    n, f_in = node_features.shape
    in_p = kernel_params[0]["in_dim_p"]
    x = jnp.pad(node_features.astype(jnp.float32), ((0, 0), (0, in_p - f_in)))

    np_ = _rup(n, tile)
    adj_sq = adj if np_ == n else jnp.pad(adj, ((0, np_ - n), (0, np_ - n)))
    adj_b = adj_sq.astype(jnp.bfloat16)            # 0/1 adjacency: exact in bf16,
                                                   # halves N^2 HBM traffic; padded
                                                   # and cast once, reused per layer.
    n_layers = len(kernel_params)
    for i, lp in enumerate(kernel_params):
        x = dgnn_layer_forward(x, adj_b, lp, final_relu=(i + 1 < n_layers),
                               n_true=n, tile=tile)
    out = x[:, :kernel_params[-1]["out_dim"]]      # strip feature padding
    support = out
    return out, support


# ---------------------------------------------------------------------------
# Pure-JAX reference (original unpadded math: concat + unfolded BN) for checking
# ---------------------------------------------------------------------------
def _ref_forward(raw_params, x, adj):
    hp = jax.lax.Precision.HIGHEST
    n_layers = len(raw_params)
    for i, stages in enumerate(raw_params):
        msg = jnp.dot(adj, x, precision=hp)
        h = jnp.concatenate([x, msg], axis=1)
        for s, (gamma, beta, w_t, b) in enumerate(stages):
            mean = jnp.mean(h, axis=0, keepdims=True)
            var = jnp.mean((h - mean) ** 2, axis=0, keepdims=True)
            h = (h - mean) * jax.lax.rsqrt(var + BN_EPS) * gamma + beta
            if s > 0:
                h = jnp.maximum(h, 0.0)
            h = jnp.dot(h, w_t, precision=hp) + b
        if i + 1 < n_layers:
            h = jnp.maximum(h, 0.0)
        x = h
    return x, x


# ---------------------------------------------------------------------------
if __name__ == "__main__":
    key = jax.random.PRNGKey(0)

    # Small, shape-consistent config (phi = identity => phi_features[i] must
    # equal that layer's input feature count).
    N = 512
    IN_FEATURES = 64
    PHI_FEATURES = [64, 96]
    OUT_FEATURES = [[96, 96], [48]]
    TILE = 256                                    # spmm grid = (2, 2) at N=512

    k_params, k_x, k_adj = jax.random.split(key, 3)
    raw_params, kernel_params = build_exp_graph_nn_nd(
        k_params, IN_FEATURES, PHI_FEATURES, OUT_FEATURES)

    node_features = jax.random.normal(k_x, (N, IN_FEATURES), jnp.float32)
    adj = (jax.random.uniform(k_adj, (N, N)) < 0.05).astype(jnp.float32)

    x_out, support = exp_graph_nn_nd_forward(kernel_params, node_features, adj,
                                             tile=TILE)
    x_out = jax.block_until_ready(x_out)
    support = jax.block_until_ready(support)

    # Sanity check against the pure-JAX reference of the original math.
    # Tolerance covers possible f32-matmul pass-count differences between the
    # XLA reference dot and the in-kernel Mosaic dot.
    x_ref, _ = _ref_forward(raw_params, node_features, adj)
    assert x_out.shape == (N, OUT_FEATURES[-1][-1])
    assert jnp.allclose(x_out, x_ref, rtol=2e-2, atol=2e-2), "mismatch vs reference"
    assert jnp.array_equal(x_out, support)

    print("KERNEL_OK")
</pallas_src>

<mosaic_0001>
module attributes {stable_mosaic.version = 11 : i64} {
  func.func @_spmm_kernel(%arg0: i32, %arg1: i32, %arg2: memref<256x256xbf16, #tpu.memory_space<vmem>>, %arg3: memref<256x128xf32, #tpu.memory_space<vmem>>, %arg4: memref<256x128xf32, #tpu.memory_space<vmem>>, %arg5: memref<256x128xf32, #tpu.memory_space<vmem>>) attributes {dimension_semantics = [#tpu.dimension_semantics<parallel>, #tpu.dimension_semantics<arbitrary>], iteration_bounds = array<i64: 2, 2>, scalar_prefetch = 0 : i64, scratch_operands = 1 : i64, tpu.core_type = #tpu.core_type<tc>, window_params = [{transform_indices = @transform_0, window_bounds = array<i64: 256, 256>}, {transform_indices = @transform_1, window_bounds = array<i64: 256, 128>}, {transform_indices = @transform_2, window_bounds = array<i64: 256, 128>}]} {
    %c0_i32 = arith.constant 0 : i32
    %0 = arith.cmpi eq, %arg1, %c0_i32 : i32
    %1 = arith.extui %0 : i1 to i32
    %c0_i32_0 = arith.constant 0 : i32
    %2 = arith.cmpi ne, %1, %c0_i32_0 : i32
    scf.if %2 {
      %cst_9 = arith.constant 0.000000e+00 : f32
      %13 = vector.broadcast %cst_9 : f32 to vector<256x128xf32>
      %c0_10 = arith.constant 0 : index
      %c0_11 = arith.constant 0 : index
      %14 = vector.load %arg5[%c0_10, %c0_11] : memref<256x128xf32, #tpu.memory_space<vmem>>, vector<256x128xf32>
      tpu.vector_store %arg5[%c0_10, %c0_11], %13 {strides = array<i32>} : memref<256x128xf32, #tpu.memory_space<vmem>>, vector<256x128xf32>,
    } else {
    }
    %c0 = arith.constant 0 : index
    %c0_1 = arith.constant 0 : index
    %3 = vector.load %arg5[%c0, %c0_1] : memref<256x128xf32, #tpu.memory_space<vmem>>, vector<256x128xf32>
    %c0_2 = arith.constant 0 : index
    %c0_3 = arith.constant 0 : index
    %4 = vector.load %arg2[%c0_2, %c0_3] : memref<256x256xbf16, #tpu.memory_space<vmem>>, vector<256x256xbf16>
    %5 = arith.extf %4 : vector<256x256xbf16> to vector<256x256xf32>
    %c0_4 = arith.constant 0 : index
    %c0_5 = arith.constant 0 : index
    %6 = vector.load %arg3[%c0_4, %c0_5] : memref<256x128xf32, #tpu.memory_space<vmem>>, vector<256x128xf32>
    %cst = arith.constant dense<0.000000e+00> : vector<256x128xf32>
    %7 = tpu.matmul %5, %6, %cst {dimension_numbers = #tpu.dot_dimension_numbers<[1], [0], [0], [1], [0, 0, 1, 1], [], []>} : vector<256x256xf32>, vector<256x128xf32>, vector<256x128xf32> -> vector<256x128xf32>
    %8 = arith.addf %3, %7 : vector<256x128xf32>
    %c0_6 = arith.constant 0 : index
    %c0_7 = arith.constant 0 : index
    %9 = vector.load %arg5[%c0_6, %c0_7] : memref<256x128xf32, #tpu.memory_space<vmem>>, vector<256x128xf32>
    tpu.vector_store %arg5[%c0_6, %c0_7], %8 {strides = array<i32>} : memref<256x128xf32, #tpu.memory_space<vmem>>, vector<256x128xf32>,
    %c1_i32 = arith.constant 1 : i32
    %10 = arith.cmpi eq, %arg1, %c1_i32 : i32
    %11 = arith.extui %10 : i1 to i32
    %c0_i32_8 = arith.constant 0 : i32
    %12 = arith.cmpi ne, %11, %c0_i32_8 : i32
    scf.if %12 {
      %c0_9 = arith.constant 0 : index
      %c0_10 = arith.constant 0 : index
      %13 = vector.load %arg5[%c0_9, %c0_10] : memref<256x128xf32, #tpu.memory_space<vmem>>, vector<256x128xf32>
      %c0_11 = arith.constant 0 : index
      %c0_12 = arith.constant 0 : index
      %14 = vector.load %arg4[%c0_11, %c0_12] : memref<256x128xf32, #tpu.memory_space<vmem>>, vector<256x128xf32>
      tpu.vector_store %arg4[%c0_11, %c0_12], %13 {strides = array<i32>} : memref<256x128xf32, #tpu.memory_space<vmem>>, vector<256x128xf32>,
    } else {
    }
    return
  }
  func.func @transform_0(%arg0: i32, %arg1: i32) -> (i32, i32) {
    %c0_i32 = arith.constant 0 : i32
    return %arg0, %arg1 : i32, i32
  }
  func.func @transform_1(%arg0: i32, %arg1: i32) -> (i32, i32) {
    %c0_i32 = arith.constant 0 : i32
    %c0_i32_0 = arith.constant 0 : i32
    return %arg1, %c0_i32 : i32, i32
  }
  func.func @transform_2(%arg0: i32, %arg1: i32) -> (i32, i32) {
    %c0_i32 = arith.constant 0 : i32
    %c0_i32_0 = arith.constant 0 : i32
    return %arg0, %c0_i32 : i32, i32
  }
}

</mosaic_0001>

<bundles_post_ra>
// kernel: tpu_custom_call.1
= control target key start
LH: loop header
LB: loop body
LE: loop exit
PB: predicated region body
PF: predicated region fallthrough
CT: control target
= control target key end

     0   :  { %s1875_s0 = inlined_call_operand.hbm [shape: bf16[512,512], index: 0, kind: input, shape index: {}]   ;;  %s1876_s1 = inlined_call_operand.hbm [shape: f32[512,128], index: 1, kind: input, shape index: {}]   ;;  %s1877_s2 = inlined_call_operand.hbm [shape: f32[512,128], index: 2, kind: output, shape index: {}]  }
   0x1   :  { %1888 = sst [smem:[#allocation16_spill]] %s1877_s2 }
   0x2   :  { %7 = vsyncpa [#allocation4], 0 }
   0x3   :  { %9 = vsyncpa [#allocation4 + $0x1], 0 }
   0x4   :  { %10 = vsyncpa [#allocation7], 0 }
   0x5   :  { %12 = vsyncpa [#allocation7 + $0x1], 0 }
   0x6   :  { %13 = vsyncpa [#allocation5], 0 }
   0x7   :  { %15 = vsyncpa [#allocation5 + $0x1], 0  ;;  %s1381_s9 = smov 0   ;;  %s1383_s10 = smov 0  }
   0x8   :  { %s1385_s11 = smov 0   ;;  %s1387_s12 = smov 0  }
   0x9   :  { %s1389_s13 = smov 0   ;;  %s1391_s14 = smov 0  }
   0xa   :  { %s1393_s15 = smov 0   ;;  %s1395_s16 = smov 0  }
   0xb   :  { %s1397_s17 = smov 0   ;;  %s1399_s18 = smov 0  }
   0xc   :  { %s1401_s19 = smov 0   ;;  %s1403_s20 = smov 0  }
   0xd   :  { %s1405_s21 = smov 0   ;;  %s1407_s22 = smov 0  }
   0xe LB: > { %1889 = sst [smem:[#allocation12_spill]] %s1338_s18  ;;  %s30_s23 = sadd.s32 1, %s1346_s20  ;;  %s1354_s22 = sphi %s1407_s22, %s21_s22   ;;  %s1350_s21 = sphi %s1405_s21, %s1931_s21   ;;  %s1346_s20 = sphi %s1403_s20, %s1930_s20   ;;  %s1342_s19 = sphi %s1401_s19, %s1929_s19   ;;  %s1338_s18 = sphi %s1399_s18, %s1928_s18   ;;  %s1334_s17 = sphi %s1397_s17, %s1927_s17   ;;  %s1330_s16 = sphi %s1395_s16, %s1926_s16   ;;  %s1326_s15 = sphi %s1393_s15, %s1925_s15   ;;  %s1322_s14 = sphi %s1391_s14, %s1924_s14   ;;  %s1318_s13 = sphi %s1389_s13, %s1923_s13   ;;  %s1314_s12 = sphi %s1387_s12, %s1922_s12   ;;  %s1310_s11 = sphi %s1385_s11, %s1921_s11   ;;  %s1306_s10 = sphi %s1383_s10, %s1920_s10   ;;  %s1302_s9 = sphi %s1381_s9, %s1919_s9  }
   0xf   : > { %1890 = sst [smem:[#allocation13_spill]] %s1342_s19  ;;  %s33_s24 = sadd.s32 1, %s1350_s21 }
  0x10   : > { %p31_p0 = scmp.ge.s32.totalorder %s30_s23, 2  ;;  %s42_s25 = sadd.s32 1, %s1334_s17 }
  0x11   : > { %p49_p1 = scmp.ne.s32.totalorder %s1334_s17, %s1330_s16  ;;  %p1882_p2 = scmp.eq.s32.totalorder %s1354_s22, 0 }
  0x12   : > { %s1933_s23 = smov (%p31_p0, %s30_s23), 0  ;;  %s1935_s24 = smov (!%p31_p0, %s33_s24), %s1350_s21 }
  0x13   : > { %1891 = sst [smem:[#allocation14_spill]] %s1933_s23  ;;  %s1462_s26 = ssub.s32 %s1346_s20, %s1933_s23 }
  0x14   : > { %p1466_p3 = por %p1882_p2, %p49_p1  ;;  %p35_p4 = scmp.ge.s32.totalorder %s1935_s24, 2 }
  0x15   : > { %s94_s28 = sadd.s32 1, %s1310_s11  ;;  %p1881_p6 = scmp.lt.s32.totalorder %s1354_s22, 4 }
  0x16   : > { %s1937_s24 = smov (%p35_p4, %s1935_s24), 0  ;;  %s131_s29 = sand.u32 1, %s1334_s17  }
  0x17   : > { %1893 = sst [smem:[#allocation15_spill]] %s1937_s24  ;;  %s37_s30 = ssub.s32 %s1350_s21, %s1937_s24 }
  0x18   : > { %s39_s3 = sor.u32 %s1462_s26, %s37_s30  ;;  %p92_p7 = scmp.eq.s32.totalorder %s37_s30, 0 }
  0x19   : > { %p40_p8 = scmp.eq.s32.totalorder %s39_s3, 0  ;;  %s904_s4 = sshll.u32 %s131_s29, 8 }
  0x1a   : > { %s1481_s5 = scalar_select %p92_p7, %s1310_s11, %s94_s28  }
  0x1b   : > { %s1484_s6 = scalar_select %p40_p8, %s1334_s17, %s42_s25  }
  0x1c   : > { %s906_s7 = sshll.u32 %s1346_s20, 1  ;;  %s923_s8 = sshll.u32 %s1350_s21, 7 }
  0x1d   : > { %s135_s23 = scalar_lea.vmem [#allocation3], %s904_s4  ;;  %s142_s19 = sadd.s32 %s923_s8, %s906_s7 }
  0x1e   : > { %s145_s2 = sshll.u32 %s135_s23, 4  ;;  %s908_s18 = sshll.u32 %s142_s19, 6  ;;  %s1488_s2 = int_to_ptr.vmem [resolvable:$true] %s145_s2 }
  0x1f   : > { %p1494_p9 = pnand %p1881_p6, %p1466_p3  ;;  %s1501_s25 = scalar_lea.hbm %s1875_s0, %s908_s18 }
  0x20   : > { %p912_p10 = scmp.ge.s32.totalorder %s1354_s22, 1  ;;  %s1504_s23 = scalar_lea.sflag [#allocation4], %s131_s29 }
  0x21   : > { %s1144_s19 = scalar_lea.hbm %s1501_s25, 4096  ;;  %p1146_p12 = pneg %p1494_p9 }
  0x22   : > { %p1145_p11 = scmp.ne.s32.totalorder %s1501_s25, %s1144_s19  ;;  %s1149_s18 = scalar_lea.hbm %s1875_s0, 16384 }
  0x23   : > { %p1150_p1 = scmp.lt.u32.totalorder %s1501_s25, %s1875_s0  ;;  %p1151_p3 = scmp.lt.u32.totalorder %s1149_s18, %s1144_s19 }
  0x24   : > { %p1147_p13 = pnand %p1146_p12, %p1145_p11  ;;  %p1153_p7 = scmp.lt.u32.totalorder %s1144_s19, %s1501_s25 }
  0x25   : > { %p1152_p4 = por %p1151_p3, %p1150_p1 }
  0x26   : > { %p1148_p0 = pneg %p1147_p13 }
  0x27   : > { %p1154_p8 = por %p1153_p7, %p1152_p4 }
  0x29   : > { %p1155_p6 = pnand %p1154_p8, %p1148_p0 }
  0x2b   : > { %1158 = shalt.err (!%p1155_p6)
}
  0x2c   : > { %s1159_s29 = scalar_lea.vmem %s1488_s2, 4096  ;;  %s1356_s8 = smov [#allocation3]  }
  0x2d   : > { %p1160_p11 = scmp.ne.s32.totalorder %s1488_s2, %s1159_s29  ;;  %s1164_s30 = sshll.u32 %s1356_s8, 4  ;;  %s1165_s30 = int_to_ptr.vmem [resolvable:$false] %s1164_s30 }
  0x2e   : > { %s1166_s3 = scalar_lea.vmem %s1165_s30, 8192  ;;  %p1167_p5 = scmp.lt.s32.totalorder %s1488_s2, %s1165_s30 }
  0x2f   : > { %p1162_p13 = pnand %p1160_p11, %p1146_p12  ;;  %p1168_p1 = scmp.lt.s32.totalorder %s1166_s3, %s1159_s29 }
  0x31   : > { %p1163_p2 = pneg %p1162_p13  ;;  %p1169_p3 = por %p1168_p1, %p1167_p5 }
  0x33   : > { %p1170_p4 = pnand %p1169_p3, %p1163_p2 }
  0x35   : > { %1173 = shalt.err (!%p1170_p4)
}
  0x36   : > { %s1357_s19 = smov 256   ;;  %s1883_s27 = smov 128  }
  0x37   : > { %s1884_s28 = smov 8   ;;  %p174_p2 = scmp.lt.s32.totalorder %s1354_s22, 5 }
  0x38   : > { %1015 = dma.hbm_to_vmem [thread:$0]  (!%p1494_p9), %s1501_s25, 4096, %s1488_s2, %s1504_s23, %s1357_s19, %s1883_s27, %s1884_s28  }
  0x39   : > { %p1537_p5 = pnand %p912_p10, %p174_p2  ;;  %s900_s4 = sadd.s32 4294967295, %s1354_s22  }
  0x3a   : > { %s901_s7 = sadd.s32 4294967294, %s1354_s22   ;;  %p56_p6 = scmp.eq.s32.totalorder %s900_s4, 0 }
  0x3b   : > { %p66_p12 = scmp.eq.s32.totalorder %s1462_s26, 0  ;;  %s68_s29 = sadd.s32 1, %s1322_s14 }
  0x3c   : > { %p75_p0 = scmp.ne.s32.totalorder %s1322_s14, %s1318_s13  ;;  %p1896_p7 = scmp.ne.s32.totalorder %s1330_s16, %s1326_s15 }
  0x3d   : > { %p81_p9 = scmp.ne.s32.totalorder %s1318_s13, %s1314_s12  ;;  %p1898_p10 = scmp.eq.s32.totalorder %s1354_s22, 0 }
  0x3e   : > { %p1550_p8 = por %p56_p6, %p1896_p7  ;;  %p104_p1 = scmp.ne.s32.totalorder %s1310_s11, %s1306_s10 }
  0x3f   : > { %s1557_s2 = scalar_select %p66_p12, %s1322_s14, %s68_s29  }
  0x40   : > { %s1897_s24 = scalar_select %p1550_p8, 1, 0 }
  0x41   : > { %p1561_p11 = por %p75_p0, %p1898_p10  ;;  %p1565_p13 = por %p81_p9, %p56_p6 }
  0x42   : > { %p105_p3 = scmp.eq.s32.totalorder %s900_s4, 3  ;;  %p110_p4 = scmp.ne.s32.totalorder %s1306_s10, %s1302_s9 }
  0x43   : > { %s1900_s26 = scalar_select %p1565_p13, 1, 0 }
  0x44   : > { %p111_p2 = scmp.eq.s32.totalorder %s901_s7, 3  ;;  %p1573_p7 = por %p105_p3, %p104_p1 }
  0x45   : > { %s155_s12 = sand.u32 1, %s1322_s14   ;;  %s924_s30 = sshll.u32 %s1346_s20, 12 }
  0x46   : > { %s1901_s15 = scalar_select %p1573_p7, 1, 0 }
  0x47   : > { %p1578_p12 = por %p111_p2, %p110_p4  ;;  %s909_s8 = sshll.u32 %s155_s12, 8 }
  0x48   : > { %s1586_s29 = scalar_lea.hbm %s1876_s1, %s924_s30  ;;  %s159_s4 = scalar_lea.vmem [#allocation6], %s909_s8 }
  0x49   : > { %s1902_s23 = scalar_select %p1578_p12, 1, 0 }
  0x4a   : > { %s166_s7 = sshll.u32 %s159_s4, 4  ;;  %p1903_p6 = scmp.lt.s32.totalorder %s1354_s22, 4  ;;  %s1596_s7 = int_to_ptr.vmem [resolvable:$true] %s166_s7 }
  0x4b   : > { %s1598_s28 = scalar_lea.sflag [#allocation7], %s155_s12  ;;  %s1174_s30 = scalar_lea.hbm %s1586_s29, 4096 }
  0x4c   : > { %p1592_p0 = pnand %p1903_p6, %p1561_p11  ;;  %p1175_p9 = scmp.ne.s32.totalorder %s1586_s29, %s1174_s30 }
  0x4d   : > { %s1179_s3 = scalar_lea.hbm %s1876_s1, 8192  ;;  %p1180_p11 = scmp.lt.u32.totalorder %s1586_s29, %s1876_s1 }
  0x4e   : > { %p1176_p10 = pneg %p1592_p0  ;;  %p1181_p4 = scmp.lt.u32.totalorder %s1179_s3, %s1174_s30 }
  0x4f   : > { %p1183_p6 = scmp.lt.u32.totalorder %s1174_s30, %s1586_s29 }
  0x50   : > { %p1177_p1 = pnand %p1176_p10, %p1175_p9  ;;  %p1182_p2 = por %p1181_p4, %p1180_p11 }
  0x52   : > { %p1178_p3 = pneg %p1177_p1  ;;  %p1184_p12 = por %p1183_p6, %p1182_p2 }
  0x54   : > { %p1185_p7 = pnand %p1184_p12, %p1178_p3 }
  0x56   : > { %1188 = shalt.err (!%p1185_p7)
}
  0x57   : > { %s1189_s12 = scalar_lea.vmem %s1596_s7, 4096  ;;  %s1360_s25 = smov [#allocation6]  }
  0x58   : > { %p1190_p9 = scmp.ne.s32.totalorder %s1596_s7, %s1189_s12  ;;  %s1194_s8 = sshll.u32 %s1360_s25, 4  ;;  %s1195_s8 = int_to_ptr.vmem [resolvable:$false] %s1194_s8 }
  0x59   : > { %s1196_s19 = scalar_lea.vmem %s1195_s8, 8192  ;;  %p1197_p8 = scmp.lt.s32.totalorder %s1596_s7, %s1195_s8 }
  0x5a   : > { %p1192_p1 = pnand %p1190_p9, %p1176_p10  ;;  %p1198_p11 = scmp.lt.s32.totalorder %s1196_s19, %s1189_s12 }
  0x5c   : > { %p1193_p13 = pneg %p1192_p1  ;;  %p1199_p4 = por %p1198_p11, %p1197_p8 }
  0x5e   : > { %p1200_p2 = pnand %p1199_p4, %p1193_p13 }
  0x60   : > { %1203 = shalt.err (!%p1200_p2)
}
  0x61   : > { %s1905_s30 = smov 8   ;;  %s1906_s3 = smov 128  }
  0x62   : > { %1018 = dma.hbm_to_vmem [thread:$0]  (!%p1592_p0), %s1586_s29, 4096, %s1596_s7, %s1598_s28, %s1906_s3, %s1906_s3, %s1905_s30  }
  0x63   : > { %178 = sbr.rel (%p1537_p5) target bundleno = 513 (0x201), region = 28  ;;  %s180_s4 = sand.u32 (!%p1537_p5), 1, %s1330_s16  }
  0x64   : > { %s913_s25 = sshll.u32 (!%p1537_p5), %s180_s4, 8  ;;  %s181_s12 = scalar_lea.sflag (!%p1537_p5), [#allocation4], %s180_s4 }
  0x65   : > { %s1632_s8 = scalar_lea.vmem (!%p1537_p5), [#allocation3], %s913_s25  ;;  %p1907_p8 = scmp.ne.s32.totalorder (!%p1537_p5), %s1897_s24, 0 }
  0x6a   : > { %1289 = dma.done.wait (%p1907_p8), %s181_s12, 4096  }
  0x6b   : > { %1291 = vsyncadd (%p1907_p8), %s181_s12, 4294963200  ;;  %s189_s27 = sand.u32 1, %s1318_s13   ;;  %p1908_p5 = scmp.ne.s32.totalorder %s1900_s26, 0 }
  0x6c   : > { %s914_s19 = sshll.u32 %s189_s27, 8  ;;  %s190_s28 = scalar_lea.sflag [#allocation7], %s189_s27 }
  0x6d   : > { %s1639_s29 = scalar_lea.vmem [#allocation6], %s914_s19 }
  0x6e   : > { %1293 = dma.done.wait (%p1908_p5), %s190_s28, 4096  }
  0x6f   : > { %1295 = vsyncadd (%p1908_p5), %s190_s28, 4294963200  ;;  %s216_s18 = sand.u32 1, %s1306_s10   ;;  %s1909_s24 = sld [smem:[#allocation12_spill]] }
  0x70   : > { %s915_s7 = sshll.u32 %s216_s18, 8 }
  0x71   : > { %s1648_s30 = scalar_lea.vmem [#allocation8], %s915_s7 }
  0x75   : > { %p916_p13 = scmp.ne.s32.totalorder %s1909_s24, 0 }
  0x76   : > { %v1361_v0 = vmov (!%p916_p13), 0.0  }
  0x77   : > { %226 = sbr.rel (%p916_p13) target bundleno = 135 (0x87), region = 40  ;;  %227 = vst [vmem:[#allocation2] sm:$0xff] (!%p916_p13), %v1361_v0  ;;  %228 = vst [vmem:[#allocation2 + $0x8] sm:$0xff] (!%p916_p13), %v1361_v0 }
  0x78   : > { %229 = vst [vmem:[#allocation2 + $0x10] sm:$0xff] (!%p916_p13), %v1361_v0  ;;  %230 = vst [vmem:[#allocation2 + $0x18] sm:$0xff] (!%p916_p13), %v1361_v0 }
  0x79   : > { %231 = vst [vmem:[#allocation2 + $0x20] sm:$0xff] (!%p916_p13), %v1361_v0  ;;  %232 = vst [vmem:[#allocation2 + $0x28] sm:$0xff] (!%p916_p13), %v1361_v0 }
  0x7a   : > { %233 = vst [vmem:[#allocation2 + $0x30] sm:$0xff] (!%p916_p13), %v1361_v0  ;;  %234 = vst [vmem:[#allocation2 + $0x38] sm:$0xff] (!%p916_p13), %v1361_v0 }
  0x7b   : > { %235 = vst [vmem:[#allocation2 + $0x40] sm:$0xff] (!%p916_p13), %v1361_v0  ;;  %236 = vst [vmem:[#allocation2 + $0x48] sm:$0xff] (!%p916_p13), %v1361_v0 }
  0x7c   : > { %237 = vst [vmem:[#allocation2 + $0x50] sm:$0xff] (!%p916_p13), %v1361_v0  ;;  %238 = vst [vmem:[#allocation2 + $0x58] sm:$0xff] (!%p916_p13), %v1361_v0 }
  0x7d   : > { %239 = vst [vmem:[#allocation2 + $0x60] sm:$0xff] (!%p916_p13), %v1361_v0  ;;  %240 = vst [vmem:[#allocation2 + $0x68] sm:$0xff] (!%p916_p13), %v1361_v0 }
  0x7e   : > { %241 = vst [vmem:[#allocation2 + $0x70] sm:$0xff] %v1361_v0  ;;  %242 = vst [vmem:[#allocation2 + $0x78] sm:$0xff] %v1361_v0 }
  0x7f   : > { %243 = vst [vmem:[#allocation2 + $0x80] sm:$0xff] %v1361_v0  ;;  %244 = vst [vmem:[#allocation2 + $0x88] sm:$0xff] %v1361_v0 }
  0x80   : > { %245 = vst [vmem:[#allocation2 + $0x90] sm:$0xff] %v1361_v0  ;;  %246 = vst [vmem:[#allocation2 + $0x98] sm:$0xff] %v1361_v0 }
  0x81   : > { %247 = vst [vmem:[#allocation2 + $0xa0] sm:$0xff] %v1361_v0  ;;  %248 = vst [vmem:[#allocation2 + $0xa8] sm:$0xff] %v1361_v0 }
  0x82   : > { %249 = vst [vmem:[#allocation2 + $0xb0] sm:$0xff] %v1361_v0  ;;  %250 = vst [vmem:[#allocation2 + $0xb8] sm:$0xff] %v1361_v0 }
  0x83   : > { %251 = vst [vmem:[#allocation2 + $0xc0] sm:$0xff] %v1361_v0  ;;  %252 = vst [vmem:[#allocation2 + $0xc8] sm:$0xff] %v1361_v0 }
  0x84   : > { %253 = vst [vmem:[#allocation2 + $0xd0] sm:$0xff] %v1361_v0  ;;  %254 = vst [vmem:[#allocation2 + $0xd8] sm:$0xff] %v1361_v0 }
  0x85   : > { %255 = vst [vmem:[#allocation2 + $0xe0] sm:$0xff] %v1361_v0  ;;  %256 = vst [vmem:[#allocation2 + $0xe8] sm:$0xff] %v1361_v0 }
  0x86   : > { %257 = vst [vmem:[#allocation2 + $0xf0] sm:$0xff] %v1361_v0  ;;  %258 = vst [vmem:[#allocation2 + $0xf8] sm:$0xff] %v1361_v0 }
  0x87 PF: > { %v387_v1 = vld [vmem:[%s1639_s29] sm:$0xff]  ;;  %v388_v2 = vld [vmem:[%s1639_s29 + $0x8] sm:$0xff]  ;;  %v389_v3 = vld [vmem:[%s1639_s29 + $0x10] sm:$0xff]  ;;  %v1362_v4 = vmov 0.0|0.0   ;;  %s1910_s26 = sld [smem:[#allocation12_spill]] }
  0x88   : > { %926 = vmatprep.subr.bf16.mxu0 %v1362_v4  ;;  %974 = vmatprep.subr.bf16.mxu1 %v1362_v4  ;;  %v927_v5 = vpack.c.bf16 %v388_v2, %v387_v1  ;;  %v390_v6 = vld [vmem:[%s1639_s29 + $0x18] sm:$0xff]  ;;  %v391_v8 = vld [vmem:[%s1639_s29 + $0x20] sm:$0xff]  ;;  %v392_v9 = vld [vmem:[%s1639_s29 + $0x28] sm:$0xff] }
  0x89   : > { %v930_v7 = vpack.c.bf16 %v390_v6, %v389_v3  ;;  %v933_v10 = vpack.c.bf16 %v392_v9, %v391_v8  ;;  %v393_v11 = vld [vmem:[%s1639_s29 + $0x30] sm:$0xff]  ;;  %v394_v12 = vld [vmem:[%s1639_s29 + $0x38] sm:$0xff]  ;;  %v1666_v13 = vld [vmem:[%s1632_s8] sm:$0xff] }
  0x8a   : > { %928 = vmatpush1.bf16.msra.mxu0 %v927_v5  ;;  %990 = vmatpush1.bf16.msra.mxu1 %v927_v5  ;;  %v936_v14 = vpack.c.bf16 %v394_v12, %v393_v11  ;;  %v324_v15 = vunpack.c.h.bf16 %v1666_v13  ;;  %v1670_v16 = vld [vmem:[%s1632_s8 + $0x80] sm:$0xff]  ;;  %v396_v18 = vld [vmem:[%s1639_s29 + $0x48] sm:$0xff]  ;;  %v397_v21 = vld [vmem:[%s1639_s29 + $0x50] sm:$0xff]  ;;  %v323_v56 = vunpack.c.l.bf16 %v1666_v13 }
  0x8b   : > { %929 = vmatprep.subr.bf16.mxu0 %v1362_v4  ;;  %975 = vmatprep.subr.bf16.mxu1 %v1362_v4  ;;  %v395_v17 = vld [vmem:[%s1639_s29 + $0x40] sm:$0xff]  ;;  %v356_v19 = vunpack.c.h.bf16 %v1670_v16  ;;  %v398_v22 = vld [vmem:[%s1639_s29 + $0x58] sm:$0xff]  ;;  %v400_v25 = vld [vmem:[%s1639_s29 + $0x68] sm:$0xff]  ;;  %v355_v57 = vunpack.c.l.bf16 %v1670_v16 }
  0x8c   : > { %483 = vmatprep.mubr.f32.mxu0 %v324_v15  ;;  %v939_v20 = vpack.c.bf16 %v396_v18, %v395_v17  ;;  %v942_v23 = vpack.c.bf16 %v398_v22, %v397_v21  ;;  %v399_v24 = vld [vmem:[%s1639_s29 + $0x60] sm:$0xff]  ;;  %v401_v27 = vld [vmem:[%s1639_s29 + $0x70] sm:$0xff]  ;;  %v402_v28 = vld [vmem:[%s1639_s29 + $0x78] sm:$0xff] }
  0x8d   : > { %563 = vmatprep.mubr.f32.mxu1 %v356_v19  ;;  %v945_v26 = vpack.c.bf16 %v400_v25, %v399_v24  ;;  %v948_v29 = vpack.c.bf16 %v402_v28, %v401_v27  ;;  %v403_v30 = vld [vmem:[%s1639_s29 + $0x80] sm:$0xff]  ;;  %v404_v31 = vld [vmem:[%s1639_s29 + $0x88] sm:$0xff]  ;;  %v405_v33 = vld [vmem:[%s1639_s29 + $0x90] sm:$0xff]  ;;  %p917_p7 = scmp.ne.s32.totalorder %s1910_s26, 1 }
  0x8e   : > { %931 = vmatpush1.bf16.msra.mxu0 %v930_v7  ;;  %991 = vmatpush1.bf16.msra.mxu1 %v930_v7  ;;  %v951_v32 = vpack.c.bf16 %v404_v31, %v403_v30  ;;  %v406_v34 = vld [vmem:[%s1639_s29 + $0x98] sm:$0xff]  ;;  %v407_v36 = vld [vmem:[%s1639_s29 + $0xa0] sm:$0xff]  ;;  %v408_v37 = vld [vmem:[%s1639_s29 + $0xa8] sm:$0xff] }
  0x8f   : > { %932 = vmatprep.subr.bf16.mxu0 %v1362_v4  ;;  %976 = vmatprep.subr.bf16.mxu1 %v1362_v4  ;;  %v954_v35 = vpack.c.bf16 %v406_v34, %v405_v33  ;;  %v957_v38 = vpack.c.bf16 %v408_v37, %v407_v36  ;;  %v409_v39 = vld [vmem:[%s1639_s29 + $0xb0] sm:$0xff]  ;;  %v410_v40 = vld [vmem:[%s1639_s29 + $0xb8] sm:$0xff]  ;;  %v411_v42 = vld [vmem:[%s1639_s29 + $0xc0] sm:$0xff] }
  0x90   : > { %v960_v41 = vpack.c.bf16 %v410_v40, %v409_v39  ;;  %v412_v43 = vld [vmem:[%s1639_s29 + $0xc8] sm:$0xff]  ;;  %v413_v45 = vld [vmem:[%s1639_s29 + $0xd0] sm:$0xff]  ;;  %v414_v46 = vld [vmem:[%s1639_s29 + $0xd8] sm:$0xff] }
  0x91   : > { %v963_v44 = vpack.c.bf16 %v412_v43, %v411_v42  ;;  %v966_v47 = vpack.c.bf16 %v414_v46, %v413_v45  ;;  %v415_v48 = vld [vmem:[%s1639_s29 + $0xe0] sm:$0xff]  ;;  %v416_v49 = vld [vmem:[%s1639_s29 + $0xe8] sm:$0xff]  ;;  %v417_v51 = vld [vmem:[%s1639_s29 + $0xf0] sm:$0xff] }
  0x92   : > { %934 = vmatpush1.bf16.msra.mxu0 %v933_v10  ;;  %992 = vmatpush1.bf16.msra.mxu1 %v933_v10  ;;  %v969_v50 = vpack.c.bf16 %v416_v49, %v415_v48  ;;  %v418_v52 = vld [vmem:[%s1639_s29 + $0xf8] sm:$0xff]  ;;  %v292_v54 = vld [vmem:[%s1632_s8 + $0x8] sm:$0xff]  ;;  %v293_v60 = vld [vmem:[%s1632_s8 + $0x10] sm:$0xff] }
  0x93   : > { %935 = vmatprep.subr.bf16.mxu0 %v1362_v4  ;;  %977 = vmatprep.subr.bf16.mxu1 %v1362_v4  ;;  %v972_v53 = vpack.c.bf16 %v418_v52, %v417_v51  ;;  %v308_v55 = vld [vmem:[%s1632_s8 + $0x88] sm:$0xff]  ;;  %v326_v58 = vunpack.c.h.bf16 %v292_v54  ;;  %v309_v61 = vld [vmem:[%s1632_s8 + $0x90] sm:$0xff]  ;;  %v325_v62 = vunpack.c.l.bf16 %v292_v54  ;;  %v328_v0 = vunpack.c.h.bf16 %v293_v60  ;;  %v294_v2 = vld [vmem:[%s1632_s8 + $0x18] sm:$0xff] }
  0x94   : > { %v358_v59 = vunpack.c.h.bf16 %v308_v55  ;;  %v357_v63 = vunpack.c.l.bf16 %v308_v55  ;;  %v360_v1 = vunpack.c.h.bf16 %v309_v61  ;;  %v310_v3 = vld [vmem:[%s1632_s8 + $0x98] sm:$0xff]  ;;  %v359_v5 = vunpack.c.l.bf16 %v309_v61  ;;  %v295_v8 = vld [vmem:[%s1632_s8 + $0x20] sm:$0xff]  ;;  %v312_v15 = vld [vmem:[%s1632_s8 + $0xa8] sm:$0xff] }
  0x95   : > { %v330_v6 = vunpack.c.h.bf16 %v294_v2  ;;  %v362_v7 = vunpack.c.h.bf16 %v310_v3  ;;  %v311_v9 = vld [vmem:[%s1632_s8 + $0xa0] sm:$0xff]  ;;  %v329_v10 = vunpack.c.l.bf16 %v294_v2  ;;  %v361_v11 = vunpack.c.l.bf16 %v310_v3  ;;  %v313_v21 = vld [vmem:[%s1632_s8 + $0xb0] sm:$0xff]  ;;  %v314_v27 = vld [vmem:[%s1632_s8 + $0xb8] sm:$0xff] }
  0x96   : > { %937 = vmatpush1.bf16.msra.mxu0 %v936_v14  ;;  %993 = vmatpush1.bf16.msra.mxu1 %v936_v14  ;;  %v332_v12 = vunpack.c.h.bf16 %v295_v8  ;;  %v364_v13 = vunpack.c.h.bf16 %v311_v9  ;;  %v296_v14 = vld [vmem:[%s1632_s8 + $0x28] sm:$0xff]  ;;  %v331_v16 = vunpack.c.l.bf16 %v295_v8  ;;  %v363_v17 = vunpack.c.l.bf16 %v311_v9  ;;  %v315_v33 = vld [vmem:[%s1632_s8 + $0xc0] sm:$0xff]  ;;  %v317_v45 = vld [vmem:[%s1632_s8 + $0xd0] sm:$0xff] }
  0x97   : > { %938 = vmatprep.subr.bf16.mxu0 %v1362_v4  ;;  %978 = vmatprep.subr.bf16.mxu1 %v1362_v4  ;;  %v334_v18 = vunpack.c.h.bf16 %v296_v14  ;;  %v366_v19 = vunpack.c.h.bf16 %v312_v15  ;;  %v333_v22 = vunpack.c.l.bf16 %v296_v14  ;;  %v368_v25 = vunpack.c.h.bf16 %v313_v21  ;;  %v316_v39 = vld [vmem:[%s1632_s8 + $0xc8] sm:$0xff]  ;;  %v318_v51 = vld [vmem:[%s1632_s8 + $0xd8] sm:$0xff] }
  0x98   : > { %v370_v31 = vunpack.c.h.bf16 %v314_v27  ;;  %v372_v37 = vunpack.c.h.bf16 %v315_v33  ;;  %v374_v43 = vunpack.c.h.bf16 %v316_v39  ;;  %v376_v49 = vunpack.c.h.bf16 %v317_v45 }
  0x99   : > { %v378_v55 = vunpack.c.h.bf16 %v318_v51 }
  0x9a   : > { %940 = vmatpush1.bf16.msra.mxu0 %v939_v20  ;;  %994 = vmatpush1.bf16.msra.mxu1 %v939_v20  ;;  %v297_v20 = vld [vmem:[%s1632_s8 + $0x30] sm:$0xff] }
  0x9b   : > { %941 = vmatprep.subr.bf16.mxu0 %v1362_v4  ;;  %979 = vmatprep.subr.bf16.mxu1 %v1362_v4  ;;  %v336_v24 = vunpack.c.h.bf16 %v297_v20  ;;  %v335_v28 = vunpack.c.l.bf16 %v297_v20 }
  0x9e   : > { %943 = vmatpush1.bf16.msra.mxu0 %v942_v23  ;;  %995 = vmatpush1.bf16.msra.mxu1 %v942_v23  ;;  %v365_v23 = vunpack.c.l.bf16 %v312_v15 }
  0x9f   : > { %944 = vmatprep.subr.bf16.mxu0 %v1362_v4  ;;  %980 = vmatprep.subr.bf16.mxu1 %v1362_v4 }
  0xa2   : > { %946 = vmatpush1.bf16.msra.mxu0 %v945_v26  ;;  %996 = vmatpush1.bf16.msra.mxu1 %v945_v26  ;;  %v298_v26 = vld [vmem:[%s1632_s8 + $0x38] sm:$0xff] }
  0xa3   : > { %947 = vmatprep.subr.bf16.mxu0 %v1362_v4  ;;  %981 = vmatprep.subr.bf16.mxu1 %v1362_v4  ;;  %v338_v30 = vunpack.c.h.bf16 %v298_v26  ;;  %v337_v34 = vunpack.c.l.bf16 %v298_v26  ;;  %v260_v26 = vld [vmem:[#allocation2 + $0x8] sm:$0xff] }
  0xa6   : > { %949 = vmatpush1.bf16.msra.mxu0 %v948_v29  ;;  %997 = vmatpush1.bf16.msra.mxu1 %v948_v29  ;;  %v367_v29 = vunpack.c.l.bf16 %v313_v21 }
  0xa7   : > { %950 = vmatprep.subr.bf16.mxu0 %v1362_v4  ;;  %982 = vmatprep.subr.bf16.mxu1 %v1362_v4 }
  0xaa   : > { %952 = vmatpush1.bf16.msra.mxu0 %v951_v32  ;;  %998 = vmatpush1.bf16.msra.mxu1 %v951_v32  ;;  %v299_v32 = vld [vmem:[%s1632_s8 + $0x40] sm:$0xff] }
  0xab   : > { %953 = vmatprep.subr.bf16.mxu0 %v1362_v4  ;;  %983 = vmatprep.subr.bf16.mxu1 %v1362_v4  ;;  %v340_v36 = vunpack.c.h.bf16 %v299_v32  ;;  %v339_v40 = vunpack.c.l.bf16 %v299_v32 }
  0xae   : > { %955 = vmatpush1.bf16.msra.mxu0 %v954_v35  ;;  %999 = vmatpush1.bf16.msra.mxu1 %v954_v35  ;;  %v369_v35 = vunpack.c.l.bf16 %v314_v27  ;;  %v276_v27 = vld [vmem:[#allocation2 + $0x88] sm:$0xff] }
  0xaf   : > { %956 = vmatprep.subr.bf16.mxu0 %v1362_v4  ;;  %984 = vmatprep.subr.bf16.mxu1 %v1362_v4 }
  0xb2   : > { %958 = vmatpush1.bf16.msra.mxu0 %v957_v38  ;;  %1000 = vmatpush1.bf16.msra.mxu1 %v957_v38  ;;  %v300_v38 = vld [vmem:[%s1632_s8 + $0x48] sm:$0xff] }
  0xb3   : > { %959 = vmatprep.subr.bf16.mxu0 %v1362_v4  ;;  %985 = vmatprep.subr.bf16.mxu1 %v1362_v4  ;;  %v342_v42 = vunpack.c.h.bf16 %v300_v38  ;;  %v341_v46 = vunpack.c.l.bf16 %v300_v38 }
  0xb6   : > { %961 = vmatpush1.bf16.msra.mxu0 %v960_v41  ;;  %1001 = vmatpush1.bf16.msra.mxu1 %v960_v41  ;;  %v371_v41 = vunpack.c.l.bf16 %v315_v33 }
  0xb7   : > { %962 = vmatprep.subr.bf16.mxu0 %v1362_v4  ;;  %986 = vmatprep.subr.bf16.mxu1 %v1362_v4 }
  0xba   : > { %964 = vmatpush1.bf16.msra.mxu0 %v963_v44  ;;  %1002 = vmatpush1.bf16.msra.mxu1 %v963_v44  ;;  %v301_v44 = vld [vmem:[%s1632_s8 + $0x50] sm:$0xff] }
  0xbb   : > { %965 = vmatprep.subr.bf16.mxu0 %v1362_v4  ;;  %987 = vmatprep.subr.bf16.mxu1 %v1362_v4  ;;  %v344_v48 = vunpack.c.h.bf16 %v301_v44  ;;  %v343_v52 = vunpack.c.l.bf16 %v301_v44 }
  0xbe   : > { %967 = vmatpush1.bf16.msra.mxu0 %v966_v47  ;;  %1003 = vmatpush1.bf16.msra.mxu1 %v966_v47  ;;  %v373_v47 = vunpack.c.l.bf16 %v316_v39 }
  0xbf   : > { %968 = vmatprep.subr.bf16.mxu0 %v1362_v4  ;;  %988 = vmatprep.subr.bf16.mxu1 %v1362_v4 }
  0xc2   : > { %970 = vmatpush1.bf16.msra.mxu0 %v969_v50  ;;  %1004 = vmatpush1.bf16.msra.mxu1 %v969_v50  ;;  %v302_v50 = vld [vmem:[%s1632_s8 + $0x58] sm:$0xff] }
  0xc3   : > { %971 = vmatprep.subr.bf16.mxu0 %v1362_v4  ;;  %989 = vmatprep.subr.bf16.mxu1 %v1362_v4  ;;  %v327_v4 = vunpack.c.l.bf16 %v293_v60  ;;  %v346_v54 = vunpack.c.h.bf16 %v302_v50 }
  0xc6   : > { %973 = vmatpush1.bf16.msra.mxu0 %v972_v53  ;;  %1005 = vmatpush1.bf16.msra.mxu1 %v972_v53  ;;  %v375_v53 = vunpack.c.l.bf16 %v317_v45 }
  0xc9   : > { %484 = vmatmul.mubr.f32.vlgmr.msra.gmra.mrb[0].mxu0 %v323_v56  ;;  %564 = vmatmul.mubr.f32.vlgmr.msra.gmra.mrb[0].mxu1 %v355_v57  ;;  %v303_v56 = vld [vmem:[%s1632_s8 + $0x60] sm:$0xff] }
  0xca   : > { %488 = vmatprep.mubr.f32.mxu0 %v326_v58  ;;  %568 = vmatprep.mubr.f32.mxu1 %v358_v59  ;;  %v319_v57 = vld [vmem:[%s1632_s8 + $0xe0] sm:$0xff]  ;;  %v345_v58 = vunpack.c.l.bf16 %v302_v50  ;;  %v377_v59 = vunpack.c.l.bf16 %v318_v51  ;;  %v348_v60 = vunpack.c.h.bf16 %v303_v56 }
  0xcb   : > { %v380_v61 = vunpack.c.h.bf16 %v319_v57  ;;  %v263_v50 = vld [vmem:[#allocation2 + $0x20] sm:$0xff] }
  0xcc   : > { %v279_v51 = vld [vmem:[#allocation2 + $0xa0] sm:$0xff] }
  0xcd   : > { %489 = vmatmul.mubr.f32.gmra.mrb[2].mxu0 %v325_v62  ;;  %569 = vmatmul.mubr.f32.gmra.mrb[2].mxu1 %v357_v63  ;;  %v304_v62 = vld [vmem:[%s1632_s8 + $0x68] sm:$0xff] }
  0xce   : > { %493 = vmatprep.mubr.f32.mxu0 %v328_v0  ;;  %573 = vmatprep.mubr.f32.mxu1 %v360_v1  ;;  %v320_v63 = vld [vmem:[%s1632_s8 + $0xe8] sm:$0xff]  ;;  %v347_v0 = vunpack.c.l.bf16 %v303_v56  ;;  %v379_v1 = vunpack.c.l.bf16 %v319_v57  ;;  %v350_v2 = vunpack.c.h.bf16 %v304_v62 }
  0xcf   : > { %v382_v3 = vunpack.c.h.bf16 %v320_v63 }
  0xd1   : > { %494 = vmatmul.mubr.f32.gmra.mrb[4].mxu0 %v327_v4  ;;  %574 = vmatmul.mubr.f32.gmra.mrb[4].mxu1 %v359_v5  ;;  %v305_v4 = vld [vmem:[%s1632_s8 + $0x70] sm:$0xff] }
  0xd2   : > { %498 = vmatprep.mubr.f32.mxu0 %v330_v6  ;;  %578 = vmatprep.mubr.f32.mxu1 %v362_v7  ;;  %v321_v5 = vld [vmem:[%s1632_s8 + $0xf0] sm:$0xff]  ;;  %v349_v6 = vunpack.c.l.bf16 %v304_v62  ;;  %v381_v7 = vunpack.c.l.bf16 %v320_v63  ;;  %v352_v8 = vunpack.c.h.bf16 %v305_v4 }
  0xd3   : > { %v384_v9 = vunpack.c.h.bf16 %v321_v5 }
  0xd5   : > { %499 = vmatmul.mubr.f32.gmra.mrb[6].mxu0 %v329_v10  ;;  %579 = vmatmul.mubr.f32.gmra.mrb[6].mxu1 %v361_v11  ;;  %v306_v10 = vld [vmem:[%s1632_s8 + $0x78] sm:$0xff] }
  0xd6   : > { %503 = vmatprep.mubr.f32.mxu0 %v332_v12  ;;  %583 = vmatprep.mubr.f32.mxu1 %v364_v13  ;;  %v322_v11 = vld [vmem:[%s1632_s8 + $0xf8] sm:$0xff]  ;;  %v351_v12 = vunpack.c.l.bf16 %v305_v4  ;;  %v383_v13 = vunpack.c.l.bf16 %v321_v5  ;;  %v354_v14 = vunpack.c.h.bf16 %v306_v10 }
  0xd7   : > { %v386_v15 = vunpack.c.h.bf16 %v322_v11 }
  0xd9   : > { %504 = vmatmul.mubr.f32.gmra.mrb[8].mxu0 %v331_v16  ;;  %584 = vmatmul.mubr.f32.gmra.mrb[8].mxu1 %v363_v17  ;;  %v353_v16 = vunpack.c.l.bf16 %v306_v10  ;;  %v385_v17 = vunpack.c.l.bf16 %v322_v11  ;;  %v266_v10 = vld [vmem:[#allocation2 + $0x38] sm:$0xff] }
  0xda   : > { %508 = vmatprep.mubr.f32.mxu0 %v334_v18  ;;  %588 = vmatprep.mubr.f32.mxu1 %v366_v19  ;;  %v259_v18 = vld [vmem:[#allocation2] sm:$0xff]  ;;  %v282_v11 = vld [vmem:[#allocation2 + $0xb8] sm:$0xff] }
  0xdb   : > { %v275_v19 = vld [vmem:[#allocation2 + $0x80] sm:$0xff] }
  0xdd   : > { %509 = vmatmul.mubr.f32.gmra.mrb[10].mxu0 %v333_v22  ;;  %589 = vmatmul.mubr.f32.gmra.mrb[10].mxu1 %v365_v23 }
  0xde   : > { %513 = vmatprep.mubr.f32.mxu0 %v336_v24  ;;  %593 = vmatprep.mubr.f32.mxu1 %v368_v25 }
  0xe1   : > { %514 = vmatmul.mubr.f32.gmra.mrb[12].mxu0 %v335_v28  ;;  %594 = vmatmul.mubr.f32.gmra.mrb[12].mxu1 %v367_v29 }
  0xe2   : > { %518 = vmatprep.mubr.f32.mxu0 %v338_v30  ;;  %598 = vmatprep.mubr.f32.mxu1 %v370_v31 }
  0xe5   : > { %519 = vmatmul.mubr.f32.gmra.mrb[14].mxu0 %v337_v34  ;;  %599 = vmatmul.mubr.f32.gmra.mrb[14].mxu1 %v369_v35  ;;  %v261_v34 = vld [vmem:[#allocation2 + $0x10] sm:$0xff] }
  0xe6   : > { %523 = vmatprep.mubr.f32.mxu0 %v340_v36  ;;  %603 = vmatprep.mubr.f32.mxu1 %v372_v37  ;;  %v277_v35 = vld [vmem:[#allocation2 + $0x90] sm:$0xff] }
  0xe9   : > { %524 = vmatmul.mubr.f32.gmra.mrb[16].mxu0 %v339_v40  ;;  %604 = vmatmul.mubr.f32.gmra.mrb[16].mxu1 %v371_v41 }
  0xea   : > { %528 = vmatprep.mubr.f32.mxu0 %v342_v42  ;;  %608 = vmatprep.mubr.f32.mxu1 %v374_v43  ;;  %v262_v42 = vld [vmem:[#allocation2 + $0x18] sm:$0xff] }
  0xeb   : > { %v278_v43 = vld [vmem:[#allocation2 + $0x98] sm:$0xff] }
  0xed   : > { %529 = vmatmul.mubr.f32.gmra.mrb[18].mxu0 %v341_v46  ;;  %609 = vmatmul.mubr.f32.gmra.mrb[18].mxu1 %v373_v47 }
  0xee   : > { %533 = vmatprep.mubr.f32.mxu0 %v344_v48  ;;  %613 = vmatprep.mubr.f32.mxu1 %v376_v49 }
  0xf1   : > { %534 = vmatmul.mubr.f32.gmra.mrb[20].mxu0 %v343_v52  ;;  %614 = vmatmul.mubr.f32.gmra.mrb[20].mxu1 %v375_v53 }
  0xf2   : > { %538 = vmatprep.mubr.f32.mxu0 %v346_v54  ;;  %618 = vmatprep.mubr.f32.mxu1 %v378_v55 }
  0xf5   : > { %539 = vmatmul.mubr.f32.gmra.mrb[22].mxu0 %v345_v58  ;;  %619 = vmatmul.mubr.f32.gmra.mrb[22].mxu1 %v377_v59  ;;  %v264_v58 = vld [vmem:[#allocation2 + $0x28] sm:$0xff] }
  0xf6   : > { %543 = vmatprep.mubr.f32.mxu0 %v348_v60  ;;  %623 = vmatprep.mubr.f32.mxu1 %v380_v61  ;;  %v280_v59 = vld [vmem:[#allocation2 + $0xa8] sm:$0xff] }
  0xf9   : > { %544 = vmatmul.mubr.f32.gmra.mrb[24].mxu0 %v347_v0  ;;  %624 = vmatmul.mubr.f32.gmra.mrb[24].mxu1 %v379_v1 }
  0xfa   : > { %548 = vmatprep.mubr.f32.mxu0 %v350_v2  ;;  %628 = vmatprep.mubr.f32.mxu1 %v382_v3  ;;  %v265_v2 = vld [vmem:[#allocation2 + $0x30] sm:$0xff] }
  0xfb   : > { %v281_v3 = vld [vmem:[#allocation2 + $0xb0] sm:$0xff] }
  0xfd   : > { %549 = vmatmul.mubr.f32.gmra.mrb[26].mxu0 %v349_v6  ;;  %629 = vmatmul.mubr.f32.gmra.mrb[26].mxu1 %v381_v7 }
  0xfe   : > { %553 = vmatprep.mubr.f32.mxu0 %v352_v8  ;;  %633 = vmatprep.mubr.f32.mxu1 %v384_v9 }
 0x101   : > { %554 = vmatmul.mubr.f32.gmra.mrb[28].mxu0 %v351_v12  ;;  %634 = vmatmul.mubr.f32.gmra.mrb[28].mxu1 %v383_v13 }
 0x102   : > { %558 = vmatprep.mubr.f32.mxu0 %v354_v14  ;;  %638 = vmatprep.mubr.f32.mxu1 %v386_v15 }
 0x105   : > { %559 = vmatmul.mubr.f32.gmra.mrb[30].mxu0 %v353_v16  ;;  %639 = vmatmul.mubr.f32.gmra.mrb[30].mxu1 %v385_v17 }
 0x19c   : > { %v485_v20 = vpop.f32.mrb[0].mxu0  ;;  %v565_v21 = vpop.f32.mrb[0].mxu1 }
 0x19d   : > { %v644_v22 = vadd.f32 %v485_v20, %v259_v18  ;;  %v660_v23 = vadd.f32 %v565_v21, %v275_v19  ;;  %v487_v24 = vpop.f32.mrb[1].mxu0  ;;  %v567_v25 = vpop.f32.mrb[1].mxu1  ;;  %v267_v18 = vld [vmem:[#allocation2 + $0x40] sm:$0xff] }
 0x19e   : > { %v283_v19 = vld [vmem:[#allocation2 + $0xc0] sm:$0xff] }
 0x19f   : > { %676 = vst [vmem:[#allocation2] sm:$0xff] %v644_v22  ;;  %692 = vst [vmem:[#allocation2 + $0x80] sm:$0xff] %v660_v23 }
 0x1a0   : > { %v490_v28 = vpop.f32.mrb[2].mxu0  ;;  %v570_v29 = vpop.f32.mrb[2].mxu1 }
 0x1a1   : > { %v645_v30 = vadd.f32 %v490_v28, %v260_v26  ;;  %v661_v31 = vadd.f32 %v570_v29, %v276_v27  ;;  %v492_v32 = vpop.f32.mrb[3].mxu0  ;;  %v572_v33 = vpop.f32.mrb[3].mxu1  ;;  %v268_v26 = vld [vmem:[#allocation2 + $0x48] sm:$0xff] }
 0x1a2   : > { %v284_v27 = vld [vmem:[#allocation2 + $0xc8] sm:$0xff] }
 0x1a3   : > { %677 = vst [vmem:[#allocation2 + $0x8] sm:$0xff] %v645_v30  ;;  %693 = vst [vmem:[#allocation2 + $0x88] sm:$0xff] %v661_v31 }
 0x1a4   : > { %v495_v36 = vpop.f32.mrb[4].mxu0  ;;  %v575_v37 = vpop.f32.mrb[4].mxu1 }
 0x1a5   : > { %v646_v38 = vadd.f32 %v495_v36, %v261_v34  ;;  %v662_v39 = vadd.f32 %v575_v37, %v277_v35  ;;  %v497_v40 = vpop.f32.mrb[5].mxu0  ;;  %v577_v41 = vpop.f32.mrb[5].mxu1  ;;  %v269_v34 = vld [vmem:[#allocation2 + $0x50] sm:$0xff] }
 0x1a6   : > { %v285_v35 = vld [vmem:[#allocation2 + $0xd0] sm:$0xff] }
 0x1a7   : > { %678 = vst [vmem:[#allocation2 + $0x10] sm:$0xff] %v646_v38  ;;  %694 = vst [vmem:[#allocation2 + $0x90] sm:$0xff] %v662_v39 }
 0x1a8   : > { %v500_v44 = vpop.f32.mrb[6].mxu0  ;;  %v580_v45 = vpop.f32.mrb[6].mxu1 }
 0x1a9   : > { %v647_v46 = vadd.f32 %v500_v44, %v262_v42  ;;  %v663_v47 = vadd.f32 %v580_v45, %v278_v43  ;;  %v502_v48 = vpop.f32.mrb[7].mxu0  ;;  %v582_v49 = vpop.f32.mrb[7].mxu1  ;;  %v270_v42 = vld [vmem:[#allocation2 + $0x58] sm:$0xff] }
 0x1aa   : > { %v286_v43 = vld [vmem:[#allocation2 + $0xd8] sm:$0xff] }
 0x1ab   : > { %679 = vst [vmem:[#allocation2 + $0x18] sm:$0xff] %v647_v46  ;;  %695 = vst [vmem:[#allocation2 + $0x98] sm:$0xff] %v663_v47 }
 0x1ac   : > { %v505_v52 = vpop.f32.mrb[8].mxu0  ;;  %v585_v53 = vpop.f32.mrb[8].mxu1 }
 0x1ad   : > { %v648_v54 = vadd.f32 %v505_v52, %v263_v50  ;;  %v664_v55 = vadd.f32 %v585_v53, %v279_v51  ;;  %v507_v56 = vpop.f32.mrb[9].mxu0  ;;  %v587_v57 = vpop.f32.mrb[9].mxu1  ;;  %v271_v50 = vld [vmem:[#allocation2 + $0x60] sm:$0xff] }
 0x1ae   : > { %v287_v51 = vld [vmem:[#allocation2 + $0xe0] sm:$0xff] }
 0x1af   : > { %680 = vst [vmem:[#allocation2 + $0x20] sm:$0xff] %v648_v54  ;;  %696 = vst [vmem:[#allocation2 + $0xa0] sm:$0xff] %v664_v55 }
 0x1b0   : > { %v510_v60 = vpop.f32.mrb[10].mxu0  ;;  %v590_v61 = vpop.f32.mrb[10].mxu1 }
 0x1b1   : > { %v649_v62 = vadd.f32 %v510_v60, %v264_v58  ;;  %v665_v63 = vadd.f32 %v590_v61, %v280_v59  ;;  %v512_v0 = vpop.f32.mrb[11].mxu0  ;;  %v592_v1 = vpop.f32.mrb[11].mxu1  ;;  %v272_v58 = vld [vmem:[#allocation2 + $0x68] sm:$0xff] }
 0x1b2   : > { %v288_v59 = vld [vmem:[#allocation2 + $0xe8] sm:$0xff] }
 0x1b3   : > { %681 = vst [vmem:[#allocation2 + $0x28] sm:$0xff] %v649_v62  ;;  %697 = vst [vmem:[#allocation2 + $0xa8] sm:$0xff] %v665_v63 }
 0x1b4   : > { %v515_v4 = vpop.f32.mrb[12].mxu0  ;;  %v595_v5 = vpop.f32.mrb[12].mxu1 }
 0x1b5   : > { %v650_v6 = vadd.f32 %v515_v4, %v265_v2  ;;  %v666_v7 = vadd.f32 %v595_v5, %v281_v3  ;;  %v517_v8 = vpop.f32.mrb[13].mxu0  ;;  %v597_v9 = vpop.f32.mrb[13].mxu1  ;;  %v273_v2 = vld [vmem:[#allocation2 + $0x70] sm:$0xff] }
 0x1b6   : > { %v289_v3 = vld [vmem:[#allocation2 + $0xf0] sm:$0xff] }
 0x1b7   : > { %682 = vst [vmem:[#allocation2 + $0x30] sm:$0xff] %v650_v6  ;;  %698 = vst [vmem:[#allocation2 + $0xb0] sm:$0xff] %v666_v7 }
 0x1b8   : > { %v520_v12 = vpop.f32.mrb[14].mxu0  ;;  %v600_v13 = vpop.f32.mrb[14].mxu1 }
 0x1b9   : > { %v651_v14 = vadd.f32 %v520_v12, %v266_v10  ;;  %v667_v15 = vadd.f32 %v600_v13, %v282_v11  ;;  %v522_v16 = vpop.f32.mrb[15].mxu0  ;;  %v602_v17 = vpop.f32.mrb[15].mxu1  ;;  %v274_v10 = vld [vmem:[#allocation2 + $0x78] sm:$0xff] }
 0x1ba   : > { %v290_v11 = vld [vmem:[#allocation2 + $0xf8] sm:$0xff] }
 0x1bb   : > { %683 = vst [vmem:[#allocation2 + $0x38] sm:$0xff] %v651_v14  ;;  %699 = vst [vmem:[#allocation2 + $0xb8] sm:$0xff] %v667_v15 }
 0x1bc   : > { %v525_v20 = vpop.f32.mrb[16].mxu0  ;;  %v605_v21 = vpop.f32.mrb[16].mxu1 }
 0x1bd   : > { %v652_v22 = vadd.f32 %v525_v20, %v267_v18  ;;  %v668_v23 = vadd.f32 %v605_v21, %v283_v19  ;;  %v527_v24 = vpop.f32.mrb[17].mxu0  ;;  %v607_v25 = vpop.f32.mrb[17].mxu1  ;;  %v712_v18 = vld [vmem:[#allocation2] sm:$0xff] (!%p917_p7)  ;;  %v713_v19 = vld [vmem:[#allocation2 + $0x8] sm:$0xff] (!%p917_p7)  ;;  %v714_v20 = vld [vmem:[#allocation2 + $0x10] sm:$0xff] (!%p917_p7) }
 0x1be   : > { %744 = vst [vmem:[%s1648_s30] sm:$0xff] (!%p917_p7), %v712_v18  ;;  %745 = vst [vmem:[%s1648_s30 + $0x8] sm:$0xff] (!%p917_p7), %v713_v19  ;;  %v715_v21 = vld [vmem:[#allocation2 + $0x18] sm:$0xff] (!%p917_p7)  ;;  %v718_v24 = vld [vmem:[#allocation2 + $0x30] sm:$0xff] (!%p917_p7) }
 0x1bf   : > { %684 = vst [vmem:[#allocation2 + $0x40] sm:$0xff] %v652_v22  ;;  %700 = vst [vmem:[#allocation2 + $0xc0] sm:$0xff] %v668_v23  ;;  %v716_v22 = vld [vmem:[#allocation2 + $0x20] sm:$0xff] (!%p917_p7)  ;;  %v717_v23 = vld [vmem:[#allocation2 + $0x28] sm:$0xff] (!%p917_p7) }
 0x1c0   : > { %v530_v28 = vpop.f32.mrb[18].mxu0  ;;  %v610_v29 = vpop.f32.mrb[18].mxu1  ;;  %746 = vst [vmem:[%s1648_s30 + $0x10] sm:$0xff] (!%p917_p7), %v714_v20  ;;  %747 = vst [vmem:[%s1648_s30 + $0x18] sm:$0xff] (!%p917_p7), %v715_v21 }
 0x1c1   : > { %v653_v30 = vadd.f32 %v530_v28, %v268_v26  ;;  %v669_v31 = vadd.f32 %v610_v29, %v284_v27  ;;  %v532_v32 = vpop.f32.mrb[19].mxu0  ;;  %v612_v33 = vpop.f32.mrb[19].mxu1  ;;  %748 = vst [vmem:[%s1648_s30 + $0x20] sm:$0xff] (!%p917_p7), %v716_v22  ;;  %749 = vst [vmem:[%s1648_s30 + $0x28] sm:$0xff] (!%p917_p7), %v717_v23 }
 0x1c2   : > { %v719_v25 = vld [vmem:[#allocation2 + $0x38] sm:$0xff] (!%p917_p7)  ;;  %750 = vst [vmem:[%s1648_s30 + $0x30] sm:$0xff] (!%p917_p7), %v718_v24 }
 0x1c3   : > { %685 = vst [vmem:[#allocation2 + $0x48] sm:$0xff] %v653_v30  ;;  %701 = vst [vmem:[#allocation2 + $0xc8] sm:$0xff] %v669_v31 }
 0x1c4   : > { %v535_v36 = vpop.f32.mrb[20].mxu0  ;;  %v615_v37 = vpop.f32.mrb[20].mxu1  ;;  %751 = vst [vmem:[%s1648_s30 + $0x38] sm:$0xff] (!%p917_p7), %v719_v25 }
 0x1c5   : > { %v654_v38 = vadd.f32 %v535_v36, %v269_v34  ;;  %v670_v39 = vadd.f32 %v615_v37, %v285_v35  ;;  %v537_v40 = vpop.f32.mrb[21].mxu0  ;;  %v617_v41 = vpop.f32.mrb[21].mxu1  ;;  %v728_v34 = vld [vmem:[#allocation2 + $0x80] sm:$0xff] (!%p917_p7)  ;;  %v729_v35 = vld [vmem:[#allocation2 + $0x88] sm:$0xff] (!%p917_p7)  ;;  %v730_v36 = vld [vmem:[#allocation2 + $0x90] sm:$0xff] (!%p917_p7) }
 0x1c6   : > { %v720_v26 = vld [vmem:[#allocation2 + $0x40] sm:$0xff] (!%p917_p7)  ;;  %760 = vst [vmem:[%s1648_s30 + $0x80] sm:$0xff] (!%p917_p7), %v728_v34  ;;  %761 = vst [vmem:[%s1648_s30 + $0x88] sm:$0xff] (!%p917_p7), %v729_v35  ;;  %v731_v37 = vld [vmem:[#allocation2 + $0x98] sm:$0xff] (!%p917_p7) }
 0x1c7   : > { %686 = vst [vmem:[#allocation2 + $0x50] sm:$0xff] %v654_v38  ;;  %702 = vst [vmem:[#allocation2 + $0xd0] sm:$0xff] %v670_v39  ;;  %v732_v38 = vld [vmem:[#allocation2 + $0xa0] sm:$0xff] (!%p917_p7)  ;;  %v733_v39 = vld [vmem:[#allocation2 + $0xa8] sm:$0xff] (!%p917_p7) }
 0x1c8   : > { %v540_v44 = vpop.f32.mrb[22].mxu0  ;;  %v620_v45 = vpop.f32.mrb[22].mxu1  ;;  %752 = vst [vmem:[%s1648_s30 + $0x40] sm:$0xff] (!%p917_p7), %v720_v26  ;;  %762 = vst [vmem:[%s1648_s30 + $0x90] sm:$0xff] (!%p917_p7), %v730_v36  ;;  %v734_v40 = vld [vmem:[#allocation2 + $0xb0] sm:$0xff] (!%p917_p7)  ;;  %v735_v41 = vld [vmem:[#allocation2 + $0xb8] sm:$0xff] (!%p917_p7) }
 0x1c9   : > { %v655_v46 = vadd.f32 %v540_v44, %v270_v42  ;;  %v671_v47 = vadd.f32 %v620_v45, %v286_v43  ;;  %v542_v48 = vpop.f32.mrb[23].mxu0  ;;  %v622_v49 = vpop.f32.mrb[23].mxu1  ;;  %763 = vst [vmem:[%s1648_s30 + $0x98] sm:$0xff] (!%p917_p7), %v731_v37  ;;  %764 = vst [vmem:[%s1648_s30 + $0xa0] sm:$0xff] (!%p917_p7), %v732_v38  ;;  %v736_v42 = vld [vmem:[#allocation2 + $0xc0] sm:$0xff] (!%p917_p7) }
 0x1ca   : > { %v721_v27 = vld [vmem:[#allocation2 + $0x48] sm:$0xff] (!%p917_p7)  ;;  %765 = vst [vmem:[%s1648_s30 + $0xa8] sm:$0xff] (!%p917_p7), %v733_v39  ;;  %766 = vst [vmem:[%s1648_s30 + $0xb0] sm:$0xff] (!%p917_p7), %v734_v40 }
 0x1cb   : > { %687 = vst [vmem:[#allocation2 + $0x58] sm:$0xff] %v655_v46  ;;  %703 = vst [vmem:[#allocation2 + $0xd8] sm:$0xff] %v671_v47  ;;  %v737_v43 = vld [vmem:[#allocation2 + $0xc8] sm:$0xff] (!%p917_p7) }
 0x1cc   : > { %v545_v52 = vpop.f32.mrb[24].mxu0  ;;  %v625_v53 = vpop.f32.mrb[24].mxu1  ;;  %753 = vst [vmem:[%s1648_s30 + $0x48] sm:$0xff] (!%p917_p7), %v721_v27  ;;  %767 = vst [vmem:[%s1648_s30 + $0xb8] sm:$0xff] (!%p917_p7), %v735_v41 }
 0x1cd   : > { %v656_v54 = vadd.f32 %v545_v52, %v271_v50  ;;  %v672_v55 = vadd.f32 %v625_v53, %v287_v51  ;;  %v547_v56 = vpop.f32.mrb[25].mxu0  ;;  %v627_v57 = vpop.f32.mrb[25].mxu1  ;;  %768 = vst [vmem:[%s1648_s30 + $0xc0] sm:$0xff] (!%p917_p7), %v736_v42  ;;  %769 = vst [vmem:[%s1648_s30 + $0xc8] sm:$0xff] (!%p917_p7), %v737_v43 }
 0x1ce   : > { %v722_v28 = vld [vmem:[#allocation2 + $0x50] sm:$0xff] (!%p917_p7) }
 0x1cf   : > { %688 = vst [vmem:[#allocation2 + $0x60] sm:$0xff] %v656_v54  ;;  %704 = vst [vmem:[#allocation2 + $0xe0] sm:$0xff] %v672_v55  ;;  %v738_v44 = vld [vmem:[#allocation2 + $0xd0] sm:$0xff] (!%p917_p7) }
 0x1d0   : > { %v550_v60 = vpop.f32.mrb[26].mxu0  ;;  %v630_v61 = vpop.f32.mrb[26].mxu1  ;;  %754 = vst [vmem:[%s1648_s30 + $0x50] sm:$0xff] (!%p917_p7), %v722_v28  ;;  %770 = vst [vmem:[%s1648_s30 + $0xd0] sm:$0xff] (!%p917_p7), %v738_v44 }
 0x1d1   : > { %v657_v62 = vadd.f32 %v550_v60, %v272_v58  ;;  %v673_v63 = vadd.f32 %v630_v61, %v288_v59  ;;  %v552_v0 = vpop.f32.mrb[27].mxu0  ;;  %v632_v1 = vpop.f32.mrb[27].mxu1 }
 0x1d2   : > { %v723_v29 = vld [vmem:[#allocation2 + $0x58] sm:$0xff] (!%p917_p7) }
 0x1d3   : > { %689 = vst [vmem:[#allocation2 + $0x68] sm:$0xff] %v657_v62  ;;  %705 = vst [vmem:[#allocation2 + $0xe8] sm:$0xff] %v673_v63  ;;  %v739_v45 = vld [vmem:[#allocation2 + $0xd8] sm:$0xff] (!%p917_p7) }
 0x1d4   : > { %v555_v4 = vpop.f32.mrb[28].mxu0  ;;  %v635_v5 = vpop.f32.mrb[28].mxu1  ;;  %755 = vst [vmem:[%s1648_s30 + $0x58] sm:$0xff] (!%p917_p7), %v723_v29  ;;  %771 = vst [vmem:[%s1648_s30 + $0xd8] sm:$0xff] (!%p917_p7), %v739_v45 }
 0x1d5   : > { %v658_v6 = vadd.f32 %v555_v4, %v273_v2  ;;  %v674_v7 = vadd.f32 %v635_v5, %v289_v3  ;;  %v557_v8 = vpop.f32.mrb[29].mxu0  ;;  %v637_v9 = vpop.f32.mrb[29].mxu1  ;;  %711 = sbr.rel (%p917_p7) target bundleno = 485 (0x1e5), region = 44 }
 0x1d6   : > { %v724_v30 = vld [vmem:[#allocation2 + $0x60] sm:$0xff] (!%p917_p7) }
 0x1d7   : > { %690 = vst [vmem:[#allocation2 + $0x70] sm:$0xff] %v658_v6  ;;  %706 = vst [vmem:[#allocation2 + $0xf0] sm:$0xff] %v674_v7  ;;  %v740_v46 = vld [vmem:[#allocation2 + $0xe0] sm:$0xff] (!%p917_p7) }
 0x1d8   : > { %v560_v12 = vpop.f32.mrb[30].mxu0  ;;  %v640_v13 = vpop.f32.mrb[30].mxu1  ;;  %756 = vst [vmem:[%s1648_s30 + $0x60] sm:$0xff] (!%p917_p7), %v724_v30  ;;  %772 = vst [vmem:[%s1648_s30 + $0xe0] sm:$0xff] (!%p917_p7), %v740_v46 }
 0x1d9   : > { %v659_v14 = vadd.f32 %v560_v12, %v274_v10  ;;  %v675_v15 = vadd.f32 %v640_v13, %v290_v11  ;;  %v562_v16 = vpop.f32.mrb[31].mxu0  ;;  %v642_v17 = vpop.f32.mrb[31].mxu1 }
 0x1da   : > { %v725_v31 = vld [vmem:[#allocation2 + $0x68] sm:$0xff] (!%p917_p7) }
 0x1db   : > { %691 = vst [vmem:[#allocation2 + $0x78] sm:$0xff] %v659_v14  ;;  %707 = vst [vmem:[#allocation2 + $0xf8] sm:$0xff] %v675_v15  ;;  %v741_v47 = vld [vmem:[#allocation2 + $0xe8] sm:$0xff] (!%p917_p7) }
 0x1dc   : > { %757 = vst [vmem:[%s1648_s30 + $0x68] sm:$0xff] %v725_v31  ;;  %773 = vst [vmem:[%s1648_s30 + $0xe8] sm:$0xff] %v741_v47 }
 0x1de   : > { %v726_v32 = vld [vmem:[#allocation2 + $0x70] sm:$0xff] }
 0x1df   : > { %758 = vst [vmem:[%s1648_s30 + $0x70] sm:$0xff] %v726_v32  ;;  %v742_v48 = vld [vmem:[#allocation2 + $0xf0] sm:$0xff] }
 0x1e0   : > { %774 = vst [vmem:[%s1648_s30 + $0xf0] sm:$0xff] %v742_v48 }
 0x1e2   : > { %v727_v33 = vld [vmem:[#allocation2 + $0x78] sm:$0xff] }
 0x1e3   : > { %759 = vst [vmem:[%s1648_s30 + $0x78] sm:$0xff] %v727_v33  ;;  %v743_v49 = vld [vmem:[#allocation2 + $0xf8] sm:$0xff] }
 0x1e4   : > { %775 = vst [vmem:[%s1648_s30 + $0xf8] sm:$0xff] %v743_v49 }
 0x1e5 PF: > { %s1911_s3 = sld [smem:[#allocation13_spill]]  ;;  %s1912_s8 = sld [smem:[#allocation16_spill]] }
 0x1e6   : > { %s790_s19 = sshll.u32 %s1648_s30, 4  ;;  %s1799_s28 = scalar_lea.sflag [#allocation5], %s216_s18  ;;  %s1795_s19 = int_to_ptr.vmem [resolvable:$true] %s790_s19 }
 0x1e7   : > { %s1204_s29 = scalar_lea.vmem %s1795_s19, 4096  ;;  %p1913_p0 = scmp.ne.s32.totalorder %s1901_s15, 0 }
 0x1e8   : > { %p1205_p12 = scmp.ne.s32.totalorder %s1795_s19, %s1204_s29  ;;  %s1363_s7 = smov [#allocation8]  }
 0x1e9   : > { %s1208_s24 = sshll.u32 %s1363_s7, 4  ;;  %s1209_s24 = int_to_ptr.vmem [resolvable:$false] %s1208_s24 }
 0x1ea   : > { %p1206_p10 = pnand %p1205_p12, %p1913_p0  ;;  %s1210_s26 = scalar_lea.vmem %s1209_s24, 8192 }
 0x1eb   : > { %s925_s4 = sshll.u32 %s1911_s3, 12  ;;  %p1211_p6 = scmp.lt.s32.totalorder %s1795_s19, %s1209_s24 }
 0x1ec   : > { %s1792_s27 = scalar_lea.hbm %s1912_s8, %s925_s4  ;;  %p1207_p3 = pneg %p1206_p10 }
 0x1ed   : > { %p1212_p9 = scmp.lt.s32.totalorder %s1210_s26, %s1204_s29 }
 0x1ef   : > { %p1213_p1 = por %p1212_p9, %p1211_p6 }
 0x1f1   : > { %p1214_p11 = pnand %p1213_p1, %p1207_p3 }
 0x1f3   : > { %1217 = shalt.err (!%p1214_p11)
}
 0x1f4   : > { %s1218_s18 = scalar_lea.hbm %s1792_s27, 4096  ;;  %s1222_s4 = scalar_lea.hbm %s1912_s8, 8192 }
 0x1f5   : > { %p1219_p4 = scmp.ne.s32.totalorder %s1792_s27, %s1218_s18  ;;  %p1223_p5 = scmp.lt.u32.totalorder %s1792_s27, %s1912_s8 }
 0x1f6   : > { %p1224_p13 = scmp.lt.u32.totalorder %s1222_s4, %s1218_s18  ;;  %p1226_p12 = scmp.lt.u32.totalorder %s1218_s18, %s1792_s27 }
 0x1f7   : > { %p1220_p2 = pnand %p1219_p4, %p1913_p0 }
 0x1f8   : > { %p1225_p7 = por %p1224_p13, %p1223_p5 }
 0x1f9   : > { %p1221_p8 = pneg %p1220_p2 }
 0x1fa   : > { %p1227_p10 = por %p1226_p12, %p1225_p7 }
 0x1fc   : > { %p1228_p3 = pnand %p1227_p10, %p1221_p8 }
 0x1fe   : > { %1231 = shalt.err (!%p1228_p3)
}
 0x1ff   : > { %s1364_s29 = smov 128   ;;  %s1365_s7 = smov 8  }
 0x200   : > { %1010 = dma.vmem_to_hbm [thread:$0]  (%p1913_p0), %s1795_s19, 4096, %s1792_s27, %s1799_s28, %s1364_s29, %s1364_s29, %s1365_s7  }
 0x201 PF: > { %p1024_p6 = scmp.ge.s32.totalorder %s1354_s22, 2  ;;  %s805_s24 = sand.u32 1, %s1302_s9  }
 0x202   : > { %p1914_p9 = scmp.ne.s32.totalorder %s1902_s23, 0  ;;  %s806_s26 = scalar_lea.sflag [#allocation5], %s805_s24 }
 0x204   : > { %p1020_p1 = pnand %p1024_p6, %p1914_p9 }
 0x206   : > { %1297 = dma.done.wait (!%p1020_p1), %s806_s26, 4096  }
 0x207   : > { %1299 = vsyncadd (!%p1020_p1), %s806_s26, 4294963200  ;;  %s21_s22 = sadd.s32 1, %s1354_s22   ;;  %s1916_s23 = sld [smem:[#allocation14_spill]] }
 0x208   : > { %p1828_p11 = scmp.ge.s32.totalorder %s21_s22, 6   ;;  %s1917_s27 = sld [smem:[#allocation15_spill]] }
 0x209   : > { %s1919_s9 = smov %s1306_s10  ;;  %s1920_s10 = smov %s1310_s11 }
 0x20a   : > { %s1921_s11 = smov %s1481_s5  ;;  %s1922_s12 = smov %s1318_s13 }
 0x20b   : > { %s1923_s13 = smov %s1322_s14  ;;  %s1924_s14 = smov %s1557_s2 }
 0x20c   : > { %s1925_s15 = smov %s1330_s16  ;;  %s1926_s16 = smov %s1334_s17 }
 0x20d   : > { %s1927_s17 = smov %s1484_s6  ;;  %s1928_s18 = smov %s1346_s20 }
 0x20e   : > { %s1929_s19 = smov %s1350_s21  ;;  %s1930_s20 = smov %s1916_s23 }
 0x20f   : > { %s1931_s21 = smov %s1917_s27  ;;  %20 = sbr.rel (!%p1828_p11) target bundleno = 14 (0xe), region = 94 }
 0x216   :  { %811 = vsyncpa [#allocation4], 1 }
 0x217   :  { %813 = vsyncpa [#allocation4 + $0x1], 1 }
 0x218   :  { %814 = vsyncpa [#allocation7], 1 }
 0x219   :  { %816 = vsyncpa [#allocation7 + $0x1], 1 }
 0x21a   :  { %817 = vsyncpa [#allocation5], 1 }
 0x21b   :  { %819 = vsyncpa [#allocation5 + $0x1], 1 }

</bundles_post_ra>
